<compile_context>
chip_gen: v7x
topology: tpu7x:2x2x1
jax: 0.10.0
libtpu: 0.0.40
codegen_flags: <defaults>
</compile_context>

<pallas_src>
import functools

import jax
import jax.numpy as jnp
from jax.experimental import pallas as pl
from jax.experimental.pallas import tpu as pltpu


# ----------------------------------------------------------------------------
# helpers
# ----------------------------------------------------------------------------
def _round_up(x: int, m: int) -> int:
    return ((x + m - 1) // m) * m


def _choose_tiles(n: int):
    """Pick (n_pad, tm, tk) so tm|n_pad and tk|n_pad with large tiles.

    Small graphs (<=512 nodes after 128-padding) run as a single tile; larger
    graphs are padded to a multiple of 512 so tm=512 always divides, and tk is
    the largest of {2048, 1024, 512} that divides n_pad (waste <= 511 rows).
    """
    n_pad = _round_up(n, 128)
    if n_pad <= 512:
        return n_pad, n_pad, n_pad
    n_pad = _round_up(n_pad, 512)
    tm = 512
    tk = 512
    for cand in (2048, 1024):
        if n_pad % cand == 0:
            tk = cand
            break
    return n_pad, tm, tk


def _pad2d(a, rows: int, cols: int, dtype):
    r, c = a.shape
    return jnp.pad(a, ((0, rows - r), (0, cols - c))).astype(dtype)


# ----------------------------------------------------------------------------
# kernel 1: feature transform  XW' = (X @ W) * d^{-1/2}
#   (right-side D^{-1/2} of A_hat folded here: one scale per output row tile,
#    single bf16 rounding of XW)
# ----------------------------------------------------------------------------
def _feature_transform_kernel(x_ref, w_ref, dinv_ref, o_ref):
    xw = jnp.dot(x_ref[...], w_ref[...], preferred_element_type=jnp.float32)
    o_ref[...] = (xw * dinv_ref[...]).astype(o_ref.dtype)


def feature_transform(x_bf16, w_bf16, dinv_col, *, tm: int):
    n_pad, f_in_pad = x_bf16.shape
    f_out_pad = w_bf16.shape[1]
    return pl.pallas_call(
        _feature_transform_kernel,
        out_shape=jax.ShapeDtypeStruct((n_pad, f_out_pad), jnp.bfloat16),
        grid_spec=pltpu.PrefetchScalarGridSpec(
            num_scalar_prefetch=0,
            grid=(n_pad // tm,),
            in_specs=[
                pl.BlockSpec((tm, f_in_pad), lambda i: (i, 0)),         # X row tile
                pl.BlockSpec((f_in_pad, f_out_pad), lambda i: (0, 0)),  # W (resident)
                pl.BlockSpec((tm, 1), lambda i: (i, 0)),                # d^-1/2 rows
            ],
            out_specs=pl.BlockSpec((tm, f_out_pad), lambda i: (i, 0)),
        ),
        compiler_params=pltpu.CompilerParams(
            dimension_semantics=("parallel",)
        ),
    )(x_bf16, w_bf16, dinv_col)


# ----------------------------------------------------------------------------
# kernel 2: aggregation  acc = (A+I) @ XW' ; out = acc * d^{-1/2} + b (+ReLU)
#   A+I streamed from HBM as int8, upcast to bf16 just before the MXU dot.
# ----------------------------------------------------------------------------
def _gcn_aggregate_kernel(a_ref, xw_ref, di_ref, b_ref, o_ref, acc_ref,
                          *, apply_relu: bool):
    k = pl.program_id(1)

    @pl.when(k == 0)
    def _():
        acc_ref[...] = jnp.zeros_like(acc_ref)

    a_bf16 = a_ref[...].astype(jnp.bfloat16)   # int8 {0,1} -> bf16, exact
    acc_ref[...] += jnp.dot(a_bf16, xw_ref[...],
                            preferred_element_type=jnp.float32)

    @pl.when(k == pl.num_programs(1) - 1)
    def _():
        # Left-side D^{-1/2}, bias, optional ReLU, lane-dense writeback.
        out = acc_ref[...] * di_ref[...] + b_ref[...]
        if apply_relu:
            out = jnp.maximum(out, 0.0)
        o_ref[...] = out.astype(o_ref.dtype)


def gcn_aggregate(a_plus_i_i8, xw, dinv_col, b2d, *, apply_relu: bool,
                  out_dtype, tm: int, tk: int):
    n_pad = a_plus_i_i8.shape[0]
    f_out_pad = xw.shape[1]
    kernel = functools.partial(_gcn_aggregate_kernel, apply_relu=apply_relu)
    return pl.pallas_call(
        kernel,
        out_shape=jax.ShapeDtypeStruct((n_pad, f_out_pad), out_dtype),
        grid_spec=pltpu.PrefetchScalarGridSpec(
            num_scalar_prefetch=0,
            grid=(n_pad // tm, n_pad // tk),
            in_specs=[
                # (A+I) tile, int8 in HBM.
                # v5e: consider pipeline_mode=pl.Buffered(3) here to hide DMA.
                pl.BlockSpec((tm, tk), lambda i, k: (i, k)),
                pl.BlockSpec((tk, f_out_pad), lambda i, k: (k, 0)),  # XW' K-rows, bf16
                pl.BlockSpec((tm, 1), lambda i, k: (i, 0)),          # d^-1/2 out rows
                pl.BlockSpec((1, f_out_pad), lambda i, k: (0, 0)),   # bias (resident)
            ],
            out_specs=pl.BlockSpec((tm, f_out_pad), lambda i, k: (i, 0)),
            scratch_shapes=[pltpu.VMEM((tm, f_out_pad), jnp.float32)],
        ),
        compiler_params=pltpu.CompilerParams(
            dimension_semantics=("parallel", "arbitrary")
        ),
    )(a_plus_i_i8, xw, dinv_col, b2d)


# ----------------------------------------------------------------------------
# SampleConv forward
# ----------------------------------------------------------------------------
def sample_conv_forward(x, adj, params):
    """Forward pass of SampleConv. Returns (mu, logvar)."""
    n, f_in = x.shape
    h1 = params["w1"].shape[1]
    h2 = params["w2"].shape[1]

    n_pad, tm, tk = _choose_tiles(n)
    f_in_pad = _round_up(f_in, 128)
    h1_pad = _round_up(h1, 128)
    f23 = 2 * h2
    f23_pad = _round_up(f23, 128)

    # --- normalization pieces: degrees from adj directly, A+I built in int8 ---
    # (no f32 N^2 intermediates: one f32 read of adj for deg, one int8 write of A)
    deg = jnp.sum(adj, axis=1) + 1.0                       # self-loop included
    dinv_sqrt = jax.lax.rsqrt(jnp.maximum(deg, 1e-12))

    diag = jnp.arange(n)
    a_i8 = jnp.pad(adj.astype(jnp.int8),
                   ((0, n_pad - n), (0, n_pad - n)))
    a_i8 = a_i8.at[diag, diag].add(jnp.int8(1))            # +I on real rows only;
    # padded rows/cols of A stay exactly zero (invariant: padded nodes never
    # contribute to real outputs).

    dinv_col = jnp.pad(dinv_sqrt, (0, n_pad - n)).reshape(n_pad, 1).astype(jnp.float32)

    # --- layer 1: hidden = relu(A_hat @ (X @ W1) + b1)  (hidden kept in bf16) ---
    x_p = _pad2d(x, n_pad, f_in_pad, jnp.bfloat16)
    w1_p = _pad2d(params["w1"], f_in_pad, h1_pad, jnp.bfloat16)
    b1_p = jnp.pad(params["b1"], (0, h1_pad - h1)).reshape(1, h1_pad).astype(jnp.float32)

    xw1 = feature_transform(x_p, w1_p, dinv_col, tm=tm)     # already * d^-1/2
    hidden = gcn_aggregate(a_i8, xw1, dinv_col, b1_p,
                           apply_relu=True, out_dtype=jnp.bfloat16, tm=tm, tk=tk)

    # --- fused mu|logvar: one aggregation over concat(W2, W3) ---
    w23 = jnp.concatenate([params["w2"], params["w3"]], axis=1)   # (h1, 2*h2)
    b23 = jnp.concatenate([params["b2"], params["b3"]], axis=0)   # (2*h2,)
    w23_p = _pad2d(w23, h1_pad, f23_pad, jnp.bfloat16)
    b23_p = jnp.pad(b23, (0, f23_pad - f23)).reshape(1, f23_pad).astype(jnp.float32)

    xw23 = feature_transform(hidden, w23_p, dinv_col, tm=tm)
    mulog = gcn_aggregate(a_i8, xw23, dinv_col, b23_p,
                          apply_relu=False, out_dtype=jnp.float32, tm=tm, tk=tk)

    mu = mulog[:n, :h2]
    logvar = mulog[:n, h2:f23]
    return mu, logvar


def init_params(key, input_feat_dim, hidden_dim1, hidden_dim2):
    """Deterministic glorot-style initialization of the 3 GCNConv layers."""
    k1, k2, k3 = jax.random.split(key, 3)

    def glorot(k, fan_in, fan_out):
        limit = jnp.sqrt(6.0 / (fan_in + fan_out))
        return jax.random.uniform(
            k, (fan_in, fan_out), jnp.float32, minval=-limit, maxval=limit
        )

    return {
        "w1": glorot(k1, input_feat_dim, hidden_dim1),
        "b1": jnp.zeros((hidden_dim1,), jnp.float32),
        "w2": glorot(k2, hidden_dim1, hidden_dim2),
        "b2": jnp.zeros((hidden_dim2,), jnp.float32),
        "w3": glorot(k3, hidden_dim1, hidden_dim2),
        "b3": jnp.zeros((hidden_dim2,), jnp.float32),
    }


if __name__ == "__main__":
    # Small synthetic graph: 16 nodes, 16 input features, hidden dims 32 -> 16.
    N = 16
    INPUT_FEAT_DIM = 16
    HIDDEN_DIM1 = 32
    HIDDEN_DIM2 = 16

    key = jax.random.PRNGKey(0)
    k_x, k_adj, k_p = jax.random.split(key, 3)

    x = jax.random.normal(k_x, (N, INPUT_FEAT_DIM), jnp.float32)

    # Random symmetric 0/1 adjacency (no self-loops; GCN adds them).
    upper = (jax.random.uniform(k_adj, (N, N)) > 0.7).astype(jnp.float32)
    adj = jnp.triu(upper, k=1)
    adj = adj + adj.T

    params = init_params(k_p, INPUT_FEAT_DIM, HIDDEN_DIM1, HIDDEN_DIM2)

    fwd = jax.jit(sample_conv_forward)
    mu, logvar = fwd(x, adj, params)
    jax.block_until_ready((mu, logvar))

    # Sanity check against plain-JAX f32 reference of the same math.
    a_full = adj + jnp.eye(N, dtype=adj.dtype)
    deg = jnp.sum(a_full, axis=1)
    d_inv_sqrt = jnp.where(deg > 0, 1.0 / jnp.sqrt(deg), 0.0)
    a_hat = a_full * d_inv_sqrt[:, None] * d_inv_sqrt[None, :]
    hidden_ref = jnp.maximum(a_hat @ (x @ params["w1"]) + params["b1"], 0.0)
    mu_ref = a_hat @ (hidden_ref @ params["w2"]) + params["b2"]
    logvar_ref = a_hat @ (hidden_ref @ params["w3"]) + params["b3"]

    assert mu.shape == (N, HIDDEN_DIM2) and logvar.shape == (N, HIDDEN_DIM2)
    # Tolerances loosened for the bf16 MXU path (f32 accumulation).
    assert jnp.allclose(mu, mu_ref, atol=5e-2, rtol=5e-2)
    assert jnp.allclose(logvar, logvar_ref, atol=5e-2, rtol=5e-2)

    print("KERNEL_OK")
</pallas_src>

<mosaic_0001>
module attributes {stable_mosaic.version = 11 : i64} {
  func.func @_feature_transform_kernel(%arg0: i32, %arg1: memref<128x128xbf16, #tpu.memory_space<vmem>>, %arg2: memref<128x128xbf16, #tpu.memory_space<vmem>>, %arg3: memref<128x1xf32, #tpu.memory_space<vmem>>, %arg4: memref<128x128xbf16, #tpu.memory_space<vmem>>) attributes {dimension_semantics = [#tpu.dimension_semantics<parallel>], iteration_bounds = array<i64: 1>, scalar_prefetch = 0 : i64, scratch_operands = 0 : i64, tpu.core_type = #tpu.core_type<tc>, window_params = [{transform_indices = @transform_0, window_bounds = array<i64: 128, 128>}, {pipeline_mode = #tpu.pipeline_mode<synchronous>, transform_indices = @transform_1, window_bounds = array<i64: 128, 128>}, {transform_indices = @transform_2, window_bounds = array<i64: 128, 1>}, {transform_indices = @transform_3, window_bounds = array<i64: 128, 128>}]} {
    %c0 = arith.constant 0 : index
    %c0_0 = arith.constant 0 : index
    %0 = vector.load %arg1[%c0, %c0_0] : memref<128x128xbf16, #tpu.memory_space<vmem>>, vector<128x128xbf16>
    %c0_1 = arith.constant 0 : index
    %c0_2 = arith.constant 0 : index
    %1 = vector.load %arg2[%c0_1, %c0_2] : memref<128x128xbf16, #tpu.memory_space<vmem>>, vector<128x128xbf16>
    %cst = arith.constant dense<0.000000e+00> : vector<128x128xf32>
    %2 = tpu.matmul %0, %1, %cst {dimension_numbers = #tpu.dot_dimension_numbers<[1], [0], [0], [1], [0, 0, 1, 1], [], []>} : vector<128x128xbf16>, vector<128x128xbf16>, vector<128x128xf32> -> vector<128x128xf32>
    %c0_3 = arith.constant 0 : index
    %c0_4 = arith.constant 0 : index
    %3 = vector.load %arg3[%c0_3, %c0_4] : memref<128x1xf32, #tpu.memory_space<vmem>>, vector<128x1xf32>
    %4 = vector.broadcast %3 : vector<128x1xf32> to vector<128x128xf32>
    %5 = arith.mulf %2, %4 : vector<128x128xf32>
    %6 = arith.truncf %5 : vector<128x128xf32> to vector<128x128xbf16>
    %c0_5 = arith.constant 0 : index
    %c0_6 = arith.constant 0 : index
    %7 = vector.load %arg4[%c0_5, %c0_6] : memref<128x128xbf16, #tpu.memory_space<vmem>>, vector<128x128xbf16>
    tpu.vector_store %arg4[%c0_5, %c0_6], %6 {strides = array<i32>} : memref<128x128xbf16, #tpu.memory_space<vmem>>, vector<128x128xbf16>,
    return
  }
  func.func @transform_0(%arg0: i32) -> (i32, i32) {
    %c0_i32 = arith.constant 0 : i32
    %c0_i32_0 = arith.constant 0 : i32
    return %arg0, %c0_i32 : i32, i32
  }
  func.func @transform_1(%arg0: i32) -> (i32, i32) {
    %c0_i32 = arith.constant 0 : i32
    %c0_i32_0 = arith.constant 0 : i32
    %c0_i32_1 = arith.constant 0 : i32
    return %c0_i32, %c0_i32_0 : i32, i32
  }
  func.func @transform_2(%arg0: i32) -> (i32, i32) {
    %c0_i32 = arith.constant 0 : i32
    %c0_i32_0 = arith.constant 0 : i32
    return %arg0, %c0_i32 : i32, i32
  }
  func.func @transform_3(%arg0: i32) -> (i32, i32) {
    %c0_i32 = arith.constant 0 : i32
    %c0_i32_0 = arith.constant 0 : i32
    return %arg0, %c0_i32 : i32, i32
  }
}

module attributes {stable_mosaic.version = 11 : i64} {
  func.func @_gcn_aggregate_kernel(%arg0: i32, %arg1: i32, %arg2: memref<128x128xi8, #tpu.memory_space<vmem>>, %arg3: memref<128x128xbf16, #tpu.memory_space<vmem>>, %arg4: memref<128x1xf32, #tpu.memory_space<vmem>>, %arg5: memref<1x128xf32, #tpu.memory_space<vmem>>, %arg6: memref<128x128xbf16, #tpu.memory_space<vmem>>, %arg7: memref<128x128xf32, #tpu.memory_space<vmem>>) attributes {dimension_semantics = [#tpu.dimension_semantics<parallel>, #tpu.dimension_semantics<arbitrary>], iteration_bounds = array<i64: 1, 1>, scalar_prefetch = 0 : i64, scratch_operands = 1 : i64, tpu.core_type = #tpu.core_type<tc>, window_params = [{transform_indices = @transform_0, window_bounds = array<i64: 128, 128>}, {transform_indices = @transform_1, window_bounds = array<i64: 128, 128>}, {transform_indices = @transform_2, window_bounds = array<i64: 128, 1>}, {pipeline_mode = #tpu.pipeline_mode<synchronous>, transform_indices = @transform_3, window_bounds = array<i64: 1, 128>}, {transform_indices = @transform_4, window_bounds = array<i64: 128, 128>}]} {
    %c0_i32 = arith.constant 0 : i32
    %0 = arith.cmpi eq, %arg1, %c0_i32 : i32
    %1 = arith.extui %0 : i1 to i32
    %c0_i32_0 = arith.constant 0 : i32
    %2 = arith.cmpi ne, %1, %c0_i32_0 : i32
    scf.if %2 {
      %cst_10 = arith.constant 0.000000e+00 : f32
      %13 = vector.broadcast %cst_10 : f32 to vector<128x128xf32>
      %c0_11 = arith.constant 0 : index
      %c0_12 = arith.constant 0 : index
      %14 = vector.load %arg7[%c0_11, %c0_12] : memref<128x128xf32, #tpu.memory_space<vmem>>, vector<128x128xf32>
      tpu.vector_store %arg7[%c0_11, %c0_12], %13 {strides = array<i32>} : memref<128x128xf32, #tpu.memory_space<vmem>>, vector<128x128xf32>,
    } else {
    }
    %c0 = arith.constant 0 : index
    %c0_1 = arith.constant 0 : index
    %3 = vector.load %arg2[%c0, %c0_1] : memref<128x128xi8, #tpu.memory_space<vmem>>, vector<128x128xi8>
    %4 = arith.sitofp %3 : vector<128x128xi8> to vector<128x128xbf16>
    %c0_2 = arith.constant 0 : index
    %c0_3 = arith.constant 0 : index
    %5 = vector.load %arg7[%c0_2, %c0_3] : memref<128x128xf32, #tpu.memory_space<vmem>>, vector<128x128xf32>
    %c0_4 = arith.constant 0 : index
    %c0_5 = arith.constant 0 : index
    %6 = vector.load %arg3[%c0_4, %c0_5] : memref<128x128xbf16, #tpu.memory_space<vmem>>, vector<128x128xbf16>
    %cst = arith.constant dense<0.000000e+00> : vector<128x128xf32>
    %7 = tpu.matmul %4, %6, %cst {dimension_numbers = #tpu.dot_dimension_numbers<[1], [0], [0], [1], [0, 0, 1, 1], [], []>} : vector<128x128xbf16>, vector<128x128xbf16>, vector<128x128xf32> -> vector<128x128xf32>
    %8 = arith.addf %5, %7 : vector<128x128xf32>
    %c0_6 = arith.constant 0 : index
    %c0_7 = arith.constant 0 : index
    %9 = vector.load %arg7[%c0_6, %c0_7] : memref<128x128xf32, #tpu.memory_space<vmem>>, vector<128x128xf32>
    tpu.vector_store %arg7[%c0_6, %c0_7], %8 {strides = array<i32>} : memref<128x128xf32, #tpu.memory_space<vmem>>, vector<128x128xf32>,
    %c0_i32_8 = arith.constant 0 : i32
    %10 = arith.cmpi eq, %arg1, %c0_i32_8 : i32
    %11 = arith.extui %10 : i1 to i32
    %c0_i32_9 = arith.constant 0 : i32
    %12 = arith.cmpi ne, %11, %c0_i32_9 : i32
    scf.if %12 {
      %c0_10 = arith.constant 0 : index
      %c0_11 = arith.constant 0 : index
      %13 = vector.load %arg7[%c0_10, %c0_11] : memref<128x128xf32, #tpu.memory_space<vmem>>, vector<128x128xf32>
      %c0_12 = arith.constant 0 : index
      %c0_13 = arith.constant 0 : index
      %14 = vector.load %arg4[%c0_12, %c0_13] : memref<128x1xf32, #tpu.memory_space<vmem>>, vector<128x1xf32>
      %15 = vector.broadcast %14 : vector<128x1xf32> to vector<128x128xf32>
      %16 = arith.mulf %13, %15 : vector<128x128xf32>
      %c0_14 = arith.constant 0 : index
      %c0_15 = arith.constant 0 : index
      %17 = vector.load %arg5[%c0_14, %c0_15] : memref<1x128xf32, #tpu.memory_space<vmem>>, vector<1x128xf32>
      %18 = vector.broadcast %17 : vector<1x128xf32> to vector<128x128xf32>
      %19 = arith.addf %16, %18 : vector<128x128xf32>
      %cst_16 = arith.constant 0.000000e+00 : f32
      %20 = vector.broadcast %cst_16 : f32 to vector<128x128xf32>
      %21 = arith.maximumf %19, %20 : vector<128x128xf32>
      %22 = arith.truncf %21 : vector<128x128xf32> to vector<128x128xbf16>
      %c0_17 = arith.constant 0 : index
      %c0_18 = arith.constant 0 : index
      %23 = vector.load %arg6[%c0_17, %c0_18] : memref<128x128xbf16, #tpu.memory_space<vmem>>, vector<128x128xbf16>
      tpu.vector_store %arg6[%c0_17, %c0_18], %22 {strides = array<i32>} : memref<128x128xbf16, #tpu.memory_space<vmem>>, vector<128x128xbf16>,
    } else {
    }
    return
  }
  func.func @transform_0(%arg0: i32, %arg1: i32) -> (i32, i32) {
    %c0_i32 = arith.constant 0 : i32
    return %arg0, %arg1 : i32, i32
  }
  func.func @transform_1(%arg0: i32, %arg1: i32) -> (i32, i32) {
    %c0_i32 = arith.constant 0 : i32
    %c0_i32_0 = arith.constant 0 : i32
    return %arg1, %c0_i32 : i32, i32
  }
  func.func @transform_2(%arg0: i32, %arg1: i32) -> (i32, i32) {
    %c0_i32 = arith.constant 0 : i32
    %c0_i32_0 = arith.constant 0 : i32
    return %arg0, %c0_i32 : i32, i32
  }
  func.func @transform_3(%arg0: i32, %arg1: i32) -> (i32, i32) {
    %c0_i32 = arith.constant 0 : i32
    %c0_i32_0 = arith.constant 0 : i32
    %c0_i32_1 = arith.constant 0 : i32
    return %c0_i32, %c0_i32_0 : i32, i32
  }
  func.func @transform_4(%arg0: i32, %arg1: i32) -> (i32, i32) {
    %c0_i32 = arith.constant 0 : i32
    %c0_i32_0 = arith.constant 0 : i32
    return %arg0, %c0_i32 : i32, i32
  }
}

module attributes {stable_mosaic.version = 11 : i64} {
  func.func @_gcn_aggregate_kernel(%arg0: i32, %arg1: i32, %arg2: memref<128x128xi8, #tpu.memory_space<vmem>>, %arg3: memref<128x128xbf16, #tpu.memory_space<vmem>>, %arg4: memref<128x1xf32, #tpu.memory_space<vmem>>, %arg5: memref<1x128xf32, #tpu.memory_space<vmem>>, %arg6: memref<128x128xf32, #tpu.memory_space<vmem>>, %arg7: memref<128x128xf32, #tpu.memory_space<vmem>>) attributes {dimension_semantics = [#tpu.dimension_semantics<parallel>, #tpu.dimension_semantics<arbitrary>], iteration_bounds = array<i64: 1, 1>, scalar_prefetch = 0 : i64, scratch_operands = 1 : i64, tpu.core_type = #tpu.core_type<tc>, window_params = [{transform_indices = @transform_0, window_bounds = array<i64: 128, 128>}, {transform_indices = @transform_1, window_bounds = array<i64: 128, 128>}, {transform_indices = @transform_2, window_bounds = array<i64: 128, 1>}, {pipeline_mode = #tpu.pipeline_mode<synchronous>, transform_indices = @transform_3, window_bounds = array<i64: 1, 128>}, {transform_indices = @transform_4, window_bounds = array<i64: 128, 128>}]} {
    %c0_i32 = arith.constant 0 : i32
    %0 = arith.cmpi eq, %arg1, %c0_i32 : i32
    %1 = arith.extui %0 : i1 to i32
    %c0_i32_0 = arith.constant 0 : i32
    %2 = arith.cmpi ne, %1, %c0_i32_0 : i32
    scf.if %2 {
      %cst_10 = arith.constant 0.000000e+00 : f32
      %13 = vector.broadcast %cst_10 : f32 to vector<128x128xf32>
      %c0_11 = arith.constant 0 : index
      %c0_12 = arith.constant 0 : index
      %14 = vector.load %arg7[%c0_11, %c0_12] : memref<128x128xf32, #tpu.memory_space<vmem>>, vector<128x128xf32>
      tpu.vector_store %arg7[%c0_11, %c0_12], %13 {strides = array<i32>} : memref<128x128xf32, #tpu.memory_space<vmem>>, vector<128x128xf32>,
    } else {
    }
    %c0 = arith.constant 0 : index
    %c0_1 = arith.constant 0 : index
    %3 = vector.load %arg2[%c0, %c0_1] : memref<128x128xi8, #tpu.memory_space<vmem>>, vector<128x128xi8>
    %4 = arith.sitofp %3 : vector<128x128xi8> to vector<128x128xbf16>
    %c0_2 = arith.constant 0 : index
    %c0_3 = arith.constant 0 : index
    %5 = vector.load %arg7[%c0_2, %c0_3] : memref<128x128xf32, #tpu.memory_space<vmem>>, vector<128x128xf32>
    %c0_4 = arith.constant 0 : index
    %c0_5 = arith.constant 0 : index
    %6 = vector.load %arg3[%c0_4, %c0_5] : memref<128x128xbf16, #tpu.memory_space<vmem>>, vector<128x128xbf16>
    %cst = arith.constant dense<0.000000e+00> : vector<128x128xf32>
    %7 = tpu.matmul %4, %6, %cst {dimension_numbers = #tpu.dot_dimension_numbers<[1], [0], [0], [1], [0, 0, 1, 1], [], []>} : vector<128x128xbf16>, vector<128x128xbf16>, vector<128x128xf32> -> vector<128x128xf32>
    %8 = arith.addf %5, %7 : vector<128x128xf32>
    %c0_6 = arith.constant 0 : index
    %c0_7 = arith.constant 0 : index
    %9 = vector.load %arg7[%c0_6, %c0_7] : memref<128x128xf32, #tpu.memory_space<vmem>>, vector<128x128xf32>
    tpu.vector_store %arg7[%c0_6, %c0_7], %8 {strides = array<i32>} : memref<128x128xf32, #tpu.memory_space<vmem>>, vector<128x128xf32>,
    %c0_i32_8 = arith.constant 0 : i32
    %10 = arith.cmpi eq, %arg1, %c0_i32_8 : i32
    %11 = arith.extui %10 : i1 to i32
    %c0_i32_9 = arith.constant 0 : i32
    %12 = arith.cmpi ne, %11, %c0_i32_9 : i32
    scf.if %12 {
      %c0_10 = arith.constant 0 : index
      %c0_11 = arith.constant 0 : index
      %13 = vector.load %arg7[%c0_10, %c0_11] : memref<128x128xf32, #tpu.memory_space<vmem>>, vector<128x128xf32>
      %c0_12 = arith.constant 0 : index
      %c0_13 = arith.constant 0 : index
      %14 = vector.load %arg4[%c0_12, %c0_13] : memref<128x1xf32, #tpu.memory_space<vmem>>, vector<128x1xf32>
      %15 = vector.broadcast %14 : vector<128x1xf32> to vector<128x128xf32>
      %16 = arith.mulf %13, %15 : vector<128x128xf32>
      %c0_14 = arith.constant 0 : index
      %c0_15 = arith.constant 0 : index
      %17 = vector.load %arg5[%c0_14, %c0_15] : memref<1x128xf32, #tpu.memory_space<vmem>>, vector<1x128xf32>
      %18 = vector.broadcast %17 : vector<1x128xf32> to vector<128x128xf32>
      %19 = arith.addf %16, %18 : vector<128x128xf32>
      %c0_16 = arith.constant 0 : index
      %c0_17 = arith.constant 0 : index
      %20 = vector.load %arg6[%c0_16, %c0_17] : memref<128x128xf32, #tpu.memory_space<vmem>>, vector<128x128xf32>
      tpu.vector_store %arg6[%c0_16, %c0_17], %19 {strides = array<i32>} : memref<128x128xf32, #tpu.memory_space<vmem>>, vector<128x128xf32>,
    } else {
    }
    return
  }
  func.func @transform_0(%arg0: i32, %arg1: i32) -> (i32, i32) {
    %c0_i32 = arith.constant 0 : i32
    return %arg0, %arg1 : i32, i32
  }
  func.func @transform_1(%arg0: i32, %arg1: i32) -> (i32, i32) {
    %c0_i32 = arith.constant 0 : i32
    %c0_i32_0 = arith.constant 0 : i32
    return %arg1, %c0_i32 : i32, i32
  }
  func.func @transform_2(%arg0: i32, %arg1: i32) -> (i32, i32) {
    %c0_i32 = arith.constant 0 : i32
    %c0_i32_0 = arith.constant 0 : i32
    return %arg0, %c0_i32 : i32, i32
  }
  func.func @transform_3(%arg0: i32, %arg1: i32) -> (i32, i32) {
    %c0_i32 = arith.constant 0 : i32
    %c0_i32_0 = arith.constant 0 : i32
    %c0_i32_1 = arith.constant 0 : i32
    return %c0_i32, %c0_i32_0 : i32, i32
  }
  func.func @transform_4(%arg0: i32, %arg1: i32) -> (i32, i32) {
    %c0_i32 = arith.constant 0 : i32
    %c0_i32_0 = arith.constant 0 : i32
    return %arg0, %c0_i32 : i32, i32
  }
}

</mosaic_0001>

<bundles_post_ra>
// kernel: sample_conv_forward.4
= control target key start
LH: loop header
LB: loop body
LE: loop exit
PB: predicated region body
PF: predicated region fallthrough
CT: control target
= control target key end

     0   :  { %v614_v1 = vmov 0   ;;  %s755_s1 = inlined_call_operand.vmem [shape: bf16[128,128], index: 1, kind: input, shape index: {}]   ;;  %s756_s0 = inlined_call_operand.vmem [shape: bf16[128,128], index: 0, kind: input, shape index: {}]   ;;  %s757_s2 = inlined_call_operand.vmem [shape: f32[128,1], index: 2, kind: input, shape index: {}]   ;;  %s758_s3 = inlined_call_operand.vmem [shape: bf16[128,128], index: 3, kind: output, shape index: {}]  }
   0x1   :  { %v598_v0 = vld [vmem:[%s755_s1] sm:$0xff]   ;;  %597 = vset.pattern.permute.xlu1 %v614_v1  ;;  %596 = vset.pattern.permute.xlu0 %v614_v1  ;;  %v599_v2 = vld [vmem:[%s755_s1 + $0x8] sm:$0xff]   ;;  %v600_v3 = vld [vmem:[%s755_s1 + $0x10] sm:$0xff]  }
   0x2   :  { %547 = vmatprep.subr.bf16.mxu0 %v598_v0  ;;  %579 = vmatprep.subr.bf16.mxu1 %v598_v0  ;;  %v601_v4 = vld [vmem:[%s755_s1 + $0x18] sm:$0xff]   ;;  %v606_v5 = vld [vmem:[%s756_s0] sm:$0xff]   ;;  %v603_v8 = vld [vmem:[%s755_s1 + $0x28] sm:$0xff]  }
   0x3   :  { %548 = vmatpush3.bf16.msra.mxu0 %v598_v0  ;;  %587 = vmatpush3.bf16.msra.mxu1 %v598_v0  ;;  %v607_v6 = vld [vmem:[%s756_s0 + $0x20] sm:$0xff]   ;;  %v242_v9 = vld [vmem:[%s757_s2 + $0x10] sm:$0xff]  ;;  %v243_v11 = vld [vmem:[%s757_s2 + $0x18] sm:$0xff] }
   0x4   :  { %549 = vmatprep.subr.bf16.mxu0 %v599_v2  ;;  %580 = vmatprep.subr.bf16.mxu1 %v599_v2  ;;  %v602_v7 = vld [vmem:[%s755_s1 + $0x20] sm:$0xff]   ;;  %v241_v12 = vld [vmem:[%s757_s2 + $0x8] sm:$0xff]  ;;  %v604_v13 = vld [vmem:[%s755_s1 + $0x30] sm:$0xff]  }
   0x5   :  { %563 = vmatprep.mubr.bf16.mxu0 %v606_v5  ;;  %571 = vmatprep.mubr.bf16.mxu1 %v607_v6  ;;  %v240_v10 = vld [vmem:[%s757_s2] sm:$0xff]  ;;  %v245_v14 = vld [vmem:[%s757_s2 + $0x28] sm:$0xff]  ;;  %v605_v16 = vld [vmem:[%s755_s1 + $0x38] sm:$0xff]  }
   0x6   :  { %268 = vperm.xlu1 %597, %v242_v9   ;;  %258 = vperm.xlu0 %596, %v240_v10   ;;  %v244_v15 = vld [vmem:[%s757_s2 + $0x20] sm:$0xff]  ;;  %v247_v17 = vld [vmem:[%s757_s2 + $0x38] sm:$0xff]  ;;  %v246_v18 = vld [vmem:[%s757_s2 + $0x30] sm:$0xff] }
   0x7   :  { %550 = vmatpush3.bf16.msra.mxu0 %v599_v2  ;;  %588 = vmatpush3.bf16.msra.mxu1 %v599_v2  ;;  %v608_v19 = vld [vmem:[%s756_s0 + $0x8] sm:$0xff]   ;;  %v248_v22 = vld [vmem:[%s757_s2 + $0x40] sm:$0xff]  ;;  %v610_v23 = vld [vmem:[%s756_s0 + $0x10] sm:$0xff]  }
   0x8   :  { %551 = vmatprep.subr.bf16.mxu0 %v600_v3  ;;  %581 = vmatprep.subr.bf16.mxu1 %v600_v3  ;;  %v609_v20 = vld [vmem:[%s756_s0 + $0x28] sm:$0xff]   ;;  %v611_v24 = vld [vmem:[%s756_s0 + $0x30] sm:$0xff]   ;;  %v251_v25 = vld [vmem:[%s757_s2 + $0x58] sm:$0xff] }
   0x9   :  { %v249_v21 = vld [vmem:[%s757_s2 + $0x48] sm:$0xff]  ;;  %v250_v26 = vld [vmem:[%s757_s2 + $0x50] sm:$0xff]  ;;  %v612_v27 = vld [vmem:[%s756_s0 + $0x18] sm:$0xff]  }
   0xa   :  { %273 = vperm.xlu1 %597, %v243_v11   ;;  %263 = vperm.xlu0 %596, %v241_v12   ;;  %v613_v28 = vld [vmem:[%s756_s0 + $0x38] sm:$0xff]   ;;  %v253_v29 = vld [vmem:[%s757_s2 + $0x68] sm:$0xff]  ;;  %v252_v30 = vld [vmem:[%s757_s2 + $0x60] sm:$0xff] }
   0xb   :  { %552 = vmatpush3.bf16.msra.mxu0 %v600_v3  ;;  %589 = vmatpush3.bf16.msra.mxu1 %v600_v3  ;;  %v255_v31 = vld [vmem:[%s757_s2 + $0x78] sm:$0xff]  ;;  %v254_v32 = vld [vmem:[%s757_s2 + $0x70] sm:$0xff] }
   0xc   :  { %553 = vmatprep.subr.bf16.mxu0 %v601_v4  ;;  %582 = vmatprep.subr.bf16.mxu1 %v601_v4 }
   0xe   :  { %283 = vperm.xlu1 %597, %v245_v14   ;;  %278 = vperm.xlu0 %596, %v244_v15  }
   0xf   :  { %554 = vmatpush3.bf16.msra.mxu0 %v601_v4  ;;  %590 = vmatpush3.bf16.msra.mxu1 %v601_v4 }
  0x10   :  { %555 = vmatprep.subr.bf16.mxu0 %v602_v7  ;;  %583 = vmatprep.subr.bf16.mxu1 %v602_v7 }
  0x12   :  { %293 = vperm.xlu1 %597, %v247_v17   ;;  %288 = vperm.xlu0 %596, %v246_v18  }
  0x13   :  { %556 = vmatpush3.bf16.msra.mxu0 %v602_v7  ;;  %591 = vmatpush3.bf16.msra.mxu1 %v602_v7 }
  0x14   :  { %557 = vmatprep.subr.bf16.mxu0 %v603_v8  ;;  %584 = vmatprep.subr.bf16.mxu1 %v603_v8 }
  0x16   :  { %303 = vperm.xlu1 %597, %v249_v21   ;;  %298 = vperm.xlu0 %596, %v248_v22  }
  0x17   :  { %558 = vmatpush3.bf16.msra.mxu0 %v603_v8  ;;  %592 = vmatpush3.bf16.msra.mxu1 %v603_v8 }
  0x18   :  { %559 = vmatprep.subr.bf16.mxu0 %v604_v13  ;;  %585 = vmatprep.subr.bf16.mxu1 %v604_v13 }
  0x1a   :  { %313 = vperm.xlu1 %597, %v251_v25   ;;  %308 = vperm.xlu0 %596, %v250_v26  }
  0x1b   :  { %560 = vmatpush3.bf16.msra.mxu0 %v604_v13  ;;  %593 = vmatpush3.bf16.msra.mxu1 %v604_v13 }
  0x1c   :  { %561 = vmatprep.subr.bf16.mxu0 %v605_v16  ;;  %586 = vmatprep.subr.bf16.mxu1 %v605_v16 }
  0x1e   :  { %323 = vperm.xlu1 %597, %v253_v29   ;;  %318 = vperm.xlu0 %596, %v252_v30  }
  0x1f   :  { %562 = vmatpush3.bf16.msra.mxu0 %v605_v16  ;;  %594 = vmatpush3.bf16.msra.mxu1 %v605_v16 }
  0x22   :  { %564 = vmatmul.mubr.bf16.vlgmr.msra.gmra.mrb[0].mxu0 %v608_v19  ;;  %572 = vmatmul.mubr.bf16.vlgmr.msra.gmra.mrb[0].mxu1 %v609_v20 }
  0x23   :  { %567 = vmatprep.mubr.bf16.mxu0 %v610_v23  ;;  %575 = vmatprep.mubr.bf16.mxu1 %v611_v24 }
  0x24   :  { %333 = vperm.xlu1 %597, %v255_v31   ;;  %328 = vperm.xlu0 %596, %v254_v32  }
  0x2a   :  { %568 = vmatmul.mubr.bf16.gmra.mrb[4].mxu0 %v612_v27  ;;  %576 = vmatmul.mubr.bf16.gmra.mrb[4].mxu1 %v613_v28 }
  0x85   :  { %v269_v33 = vpop.permute.xlu1 %268  ;;  %v259_v34 = vpop.permute.xlu0 %258 }
  0x89   :  { %v274_v35 = vpop.permute.xlu1 %273  ;;  %v264_v36 = vpop.permute.xlu0 %263 }
  0x8d   :  { %v284_v37 = vpop.permute.xlu1 %283  ;;  %v279_v38 = vpop.permute.xlu0 %278 }
  0x91   :  { %v294_v39 = vpop.permute.xlu1 %293  ;;  %v289_v40 = vpop.permute.xlu0 %288 }
  0x95   :  { %v304_v41 = vpop.permute.xlu1 %303  ;;  %v299_v42 = vpop.permute.xlu0 %298 }
  0x99   :  { %v314_v43 = vpop.permute.xlu1 %313  ;;  %v309_v44 = vpop.permute.xlu0 %308 }
  0x9d   :  { %v324_v45 = vpop.permute.xlu1 %323  ;;  %v319_v46 = vpop.permute.xlu0 %318 }
  0xa3   :  { %v334_v3 = vpop.permute.xlu1 %333  ;;  %v329_v4 = vpop.permute.xlu0 %328 }
  0xf5   :  { %v565_v47 = vpop.f32.mrb[0].mxu0  ;;  %v573_v48 = vpop.f32.mrb[0].mxu1 }
  0xf6   :  { %v177_v49 = vpop.f32.mrb[1].mxu0  ;;  %v209_v50 = vpop.f32.mrb[1].mxu1  ;;  %v338_v53 = vmul.f32 %v565_v47, %v269_v33  ;;  %v346_v54 = vmul.f32 %v573_v48, %v309_v44 }
  0xf7   :  { %v566_v51 = vpop.f32.mrb[2].mxu0  ;;  %v574_v52 = vpop.f32.mrb[2].mxu1  ;;  %v336_v59 = vmul.f32 %v259_v34, %v177_v49  ;;  %v344_v60 = vmul.f32 %v299_v42, %v209_v50 }
  0xf8   :  { %v339_v55 = vmul.f32 %v566_v51, %v274_v35  ;;  %v347_v56 = vmul.f32 %v574_v52, %v314_v43  ;;  %v180_v57 = vpop.f32.mrb[3].mxu0  ;;  %v212_v58 = vpop.f32.mrb[3].mxu1 }
  0xf9   :  { %v337_v61 = vmul.f32 %v264_v36, %v180_v57  ;;  %v345_v62 = vmul.f32 %v304_v41, %v212_v58 }
  0xfa   :  { %v492_v63 = vpack.c.bf16 %v339_v55, %v338_v53  ;;  %v512_v0 = vpack.c.bf16 %v347_v56, %v346_v54 }
  0xfb   :  { %v487_v1 = vpack.c.bf16 %v337_v61, %v336_v59  ;;  %v507_v2 = vpack.c.bf16 %v345_v62, %v344_v60 }
  0xfc   :  { %524 = vst [vmem:[%s758_s3 + $0x8] sm:$0xff] %v492_v63   ;;  %528 = vst [vmem:[%s758_s3 + $0x28] sm:$0xff] %v512_v0  }
  0xfd   :  { %488 = vst [vmem:[%s758_s3] sm:$0xff] %v487_v1   ;;  %527 = vst [vmem:[%s758_s3 + $0x20] sm:$0xff] %v507_v2   ;;  %v569_v5 = vpop.f32.mrb[4].mxu0  ;;  %v577_v6 = vpop.f32.mrb[4].mxu1 }
  0xfe   :  { %v193_v7 = vpop.f32.mrb[5].mxu0  ;;  %v225_v8 = vpop.f32.mrb[5].mxu1  ;;  %v342_v11 = vmul.f32 %v569_v5, %v289_v40  ;;  %v350_v12 = vmul.f32 %v577_v6, %v329_v4 }
  0xff   :  { %v570_v9 = vpop.f32.mrb[6].mxu0  ;;  %v578_v10 = vpop.f32.mrb[6].mxu1  ;;  %v340_v17 = vmul.f32 %v279_v38, %v193_v7  ;;  %v348_v18 = vmul.f32 %v319_v46, %v225_v8 }
 0x100   :  { %v343_v13 = vmul.f32 %v570_v9, %v294_v39  ;;  %v351_v14 = vmul.f32 %v578_v10, %v334_v3  ;;  %v196_v15 = vpop.f32.mrb[7].mxu0  ;;  %v228_v16 = vpop.f32.mrb[7].mxu1 }
 0x101   :  { %v341_v19 = vmul.f32 %v284_v37, %v196_v15  ;;  %v349_v20 = vmul.f32 %v324_v45, %v228_v16 }
 0x102   :  { %v502_v21 = vpack.c.bf16 %v343_v13, %v342_v11  ;;  %v522_v22 = vpack.c.bf16 %v351_v14, %v350_v12 }
 0x103   :  { %v497_v23 = vpack.c.bf16 %v341_v19, %v340_v17  ;;  %v517_v24 = vpack.c.bf16 %v349_v20, %v348_v18 }
 0x104   :  { %526 = vst [vmem:[%s758_s3 + $0x18] sm:$0xff] %v502_v21   ;;  %530 = vst [vmem:[%s758_s3 + $0x38] sm:$0xff] %v522_v22  }
 0x105   :  { %525 = vst [vmem:[%s758_s3 + $0x10] sm:$0xff] %v497_v23   ;;  %529 = vst [vmem:[%s758_s3 + $0x30] sm:$0xff] %v517_v24  }

// kernel: sample_conv_forward.5
= control target key start
LH: loop header
LB: loop body
LE: loop exit
PB: predicated region body
PF: predicated region fallthrough
CT: control target
= control target key end

     0   :  { %v752_v1 = vmov 0   ;;  %s952_s1 = inlined_call_operand.vmem [shape: bf16[128,128], index: 1, kind: input, shape index: {}]   ;;  %s953_s0 = inlined_call_operand.vmem [shape: s8[128,128], index: 0, kind: input, shape index: {}]   ;;  %s954_s2 = inlined_call_operand.vmem [shape: f32[128,1], index: 2, kind: input, shape index: {}]   ;;  %s955_s3 = inlined_call_operand.vmem [shape: f32[1,128], index: 3, kind: input, shape index: {}]   ;;  %s956_s4 = inlined_call_operand.vmem [shape: bf16[128,128], index: 4, kind: output, shape index: {}]  }
   0x1   :  { %v744_v0 = vld [vmem:[%s952_s1] sm:$0xff]   ;;  %743 = vset.pattern.permute.xlu1 %v752_v1  ;;  %742 = vset.pattern.permute.xlu0 %v752_v1  ;;  %v745_v2 = vld [vmem:[%s952_s1 + $0x8] sm:$0xff]   ;;  %v746_v3 = vld [vmem:[%s952_s1 + $0x10] sm:$0xff]  }
   0x2   :  { %693 = vmatprep.subr.bf16.mxu0 %v744_v0  ;;  %725 = vmatprep.subr.bf16.mxu1 %v744_v0  ;;  %v747_v4 = vld [vmem:[%s952_s1 + $0x18] sm:$0xff]   ;;  %v38_v5 = vld [vmem:[%s953_s0] sm:$0x3]  ;;  %v39_v6 = vld [vmem:[%s953_s0 + $0x2] sm:$0x3] }
   0x3   :  { %694 = vmatpush3.bf16.msra.mxu0 %v744_v0  ;;  %733 = vmatpush3.bf16.msra.mxu1 %v744_v0  ;;  %v46_v7 = vld [vmem:[%s953_s0 + $0x10] sm:$0x3]  ;;  %v54_v8 = vunpack.c.l.s8.bf16 %v38_v5  ;;  %v55_v9 = vunpack.c.l.s8.bf16 %v39_v6  ;;  %v47_v10 = vld [vmem:[%s953_s0 + $0x12] sm:$0x3]  ;;  %v748_v14 = vld [vmem:[%s952_s1 + $0x20] sm:$0xff]  }
   0x4   :  { %695 = vmatprep.subr.bf16.mxu0 %v745_v2  ;;  %726 = vmatprep.subr.bf16.mxu1 %v745_v2  ;;  %v62_v11 = vunpack.c.l.s8.bf16 %v46_v7  ;;  %v63_v12 = vunpack.c.l.s8.bf16 %v47_v10  ;;  %v348_v16 = vld [vmem:[%s954_s2 + $0x10] sm:$0xff]  ;;  %v346_v17 = vld [vmem:[%s954_s2] sm:$0xff]  ;;  %v349_v18 = vld [vmem:[%s954_s2 + $0x18] sm:$0xff] }
   0x5   :  { %v581_v13 = vcombine.low %v54_v8, %v55_v9  ;;  %374 = vperm.xlu1 %743, %v348_v16   ;;  %v749_v19 = vld [vmem:[%s952_s1 + $0x28] sm:$0xff]   ;;  %364 = vperm.xlu0 %742, %v346_v17   ;;  %v750_v22 = vld [vmem:[%s952_s1 + $0x30] sm:$0xff]   ;;  %v40_v23 = vld [vmem:[%s953_s0 + $0x4] sm:$0x3] }
   0x6   :  { %v585_v15 = vcombine.low %v62_v11, %v63_v12  ;;  %v347_v20 = vld [vmem:[%s954_s2 + $0x8] sm:$0xff]  ;;  %v751_v24 = vld [vmem:[%s952_s1 + $0x38] sm:$0xff]   ;;  %v41_v25 = vld [vmem:[%s953_s0 + $0x6] sm:$0x3]  ;;  %v56_v34 = vunpack.c.l.s8.bf16 %v40_v23 }
   0x7   :  { %696 = vmatpush3.bf16.msra.mxu0 %v745_v2  ;;  %734 = vmatpush3.bf16.msra.mxu1 %v745_v2  ;;  %v351_v21 = vld [vmem:[%s954_s2 + $0x28] sm:$0xff]  ;;  %v48_v26 = vld [vmem:[%s953_s0 + $0x14] sm:$0x3]  ;;  %v350_v27 = vld [vmem:[%s954_s2 + $0x20] sm:$0xff]  ;;  %v57_v35 = vunpack.c.l.s8.bf16 %v41_v25 }
   0x8   :  { %697 = vmatprep.subr.bf16.mxu0 %v746_v3  ;;  %727 = vmatprep.subr.bf16.mxu1 %v746_v3  ;;  %v49_v28 = vld [vmem:[%s953_s0 + $0x16] sm:$0x3]  ;;  %v42_v29 = vld [vmem:[%s953_s0 + $0x8] sm:$0x3]  ;;  %v353_v30 = vld [vmem:[%s954_s2 + $0x38] sm:$0xff]  ;;  %v64_v36 = vunpack.c.l.s8.bf16 %v48_v26 }
   0x9   :  { %709 = vmatprep.mubr.bf16.mxu0 %v581_v13  ;;  %717 = vmatprep.mubr.bf16.mxu1 %v585_v15  ;;  %v43_v31 = vld [vmem:[%s953_s0 + $0xa] sm:$0x3]  ;;  %v50_v32 = vld [vmem:[%s953_s0 + $0x18] sm:$0x3]  ;;  %v51_v33 = vld [vmem:[%s953_s0 + $0x1a] sm:$0x3]  ;;  %v65_v37 = vunpack.c.l.s8.bf16 %v49_v28  ;;  %v58_v39 = vunpack.c.l.s8.bf16 %v42_v29  ;;  %v582_v44 = vcombine.low %v56_v34, %v57_v35 }
   0xa   :  { %379 = vperm.xlu1 %743, %v349_v18   ;;  %369 = vperm.xlu0 %742, %v347_v20   ;;  %v352_v38 = vld [vmem:[%s954_s2 + $0x30] sm:$0xff]  ;;  %v59_v40 = vunpack.c.l.s8.bf16 %v43_v31  ;;  %v66_v41 = vunpack.c.l.s8.bf16 %v50_v32  ;;  %v67_v42 = vunpack.c.l.s8.bf16 %v51_v33  ;;  %v355_v43 = vld [vmem:[%s954_s2 + $0x48] sm:$0xff]  ;;  %v354_v47 = vld [vmem:[%s954_s2 + $0x40] sm:$0xff] }
   0xb   :  { %698 = vmatpush3.bf16.msra.mxu0 %v746_v3  ;;  %735 = vmatpush3.bf16.msra.mxu1 %v746_v3  ;;  %v586_v45 = vcombine.low %v64_v36, %v65_v37  ;;  %v44_v46 = vld [vmem:[%s953_s0 + $0xc] sm:$0x3]  ;;  %v45_v50 = vld [vmem:[%s953_s0 + $0xe] sm:$0x3]  ;;  %v52_v51 = vld [vmem:[%s953_s0 + $0x1c] sm:$0x3] }
   0xc   :  { %699 = vmatprep.subr.bf16.mxu0 %v747_v4  ;;  %728 = vmatprep.subr.bf16.mxu1 %v747_v4  ;;  %v583_v48 = vcombine.low %v58_v39, %v59_v40  ;;  %v587_v49 = vcombine.low %v66_v41, %v67_v42  ;;  %v53_v52 = vld [vmem:[%s953_s0 + $0x1e] sm:$0x3]  ;;  %v60_v54 = vunpack.c.l.s8.bf16 %v44_v46  ;;  %v61_v55 = vunpack.c.l.s8.bf16 %v45_v50  ;;  %v356_v58 = vld [vmem:[%s954_s2 + $0x50] sm:$0xff]  ;;  %v359_v59 = vld [vmem:[%s954_s2 + $0x68] sm:$0xff] }
   0xd   :  { %v357_v53 = vld [vmem:[%s954_s2 + $0x58] sm:$0xff]  ;;  %v68_v56 = vunpack.c.l.s8.bf16 %v52_v51  ;;  %v69_v57 = vunpack.c.l.s8.bf16 %v53_v52  ;;  %v358_v62 = vld [vmem:[%s954_s2 + $0x60] sm:$0xff]  ;;  %v360_v0 = vld [vmem:[%s954_s2 + $0x70] sm:$0xff] }
   0xe   :  { %389 = vperm.xlu1 %743, %v351_v21   ;;  %384 = vperm.xlu0 %742, %v350_v27   ;;  %v584_v60 = vcombine.low %v60_v54, %v61_v55  ;;  %v361_v63 = vld [vmem:[%s954_s2 + $0x78] sm:$0xff]  ;;  %v907_v16 = vld [vmem:[%s955_s3] ss:$0 sm:$0xff] }
   0xf   :  { %700 = vmatpush3.bf16.msra.mxu0 %v747_v4  ;;  %736 = vmatpush3.bf16.msra.mxu1 %v747_v4  ;;  %v588_v61 = vcombine.low %v68_v56, %v69_v57 }
  0x10   :  { %701 = vmatprep.subr.bf16.mxu0 %v748_v14  ;;  %729 = vmatprep.subr.bf16.mxu1 %v748_v14 }
  0x12   :  { %399 = vperm.xlu1 %743, %v353_v30   ;;  %394 = vperm.xlu0 %742, %v352_v38  }
  0x13   :  { %702 = vmatpush3.bf16.msra.mxu0 %v748_v14  ;;  %737 = vmatpush3.bf16.msra.mxu1 %v748_v14 }
  0x14   :  { %703 = vmatprep.subr.bf16.mxu0 %v749_v19  ;;  %730 = vmatprep.subr.bf16.mxu1 %v749_v19 }
  0x16   :  { %409 = vperm.xlu1 %743, %v355_v43   ;;  %404 = vperm.xlu0 %742, %v354_v47  }
  0x17   :  { %704 = vmatpush3.bf16.msra.mxu0 %v749_v19  ;;  %738 = vmatpush3.bf16.msra.mxu1 %v749_v19 }
  0x18   :  { %705 = vmatprep.subr.bf16.mxu0 %v750_v22  ;;  %731 = vmatprep.subr.bf16.mxu1 %v750_v22 }
  0x1a   :  { %419 = vperm.xlu1 %743, %v357_v53   ;;  %414 = vperm.xlu0 %742, %v356_v58  }
  0x1b   :  { %706 = vmatpush3.bf16.msra.mxu0 %v750_v22  ;;  %739 = vmatpush3.bf16.msra.mxu1 %v750_v22 }
  0x1c   :  { %707 = vmatprep.subr.bf16.mxu0 %v751_v24  ;;  %732 = vmatprep.subr.bf16.mxu1 %v751_v24 }
  0x1e   :  { %429 = vperm.xlu1 %743, %v359_v59   ;;  %424 = vperm.xlu0 %742, %v358_v62  }
  0x1f   :  { %708 = vmatpush3.bf16.msra.mxu0 %v751_v24  ;;  %740 = vmatpush3.bf16.msra.mxu1 %v751_v24 }
  0x22   :  { %710 = vmatmul.mubr.bf16.vlgmr.msra.gmra.mrb[0].mxu0 %v582_v44  ;;  %718 = vmatmul.mubr.bf16.vlgmr.msra.gmra.mrb[0].mxu1 %v586_v45 }
  0x23   :  { %713 = vmatprep.mubr.bf16.mxu0 %v583_v48  ;;  %721 = vmatprep.mubr.bf16.mxu1 %v587_v49 }
  0x24   :  { %439 = vperm.xlu1 %743, %v361_v63   ;;  %434 = vperm.xlu0 %742, %v360_v0  }
  0x2a   :  { %714 = vmatmul.mubr.bf16.gmra.mrb[4].mxu0 %v584_v60  ;;  %722 = vmatmul.mubr.bf16.gmra.mrb[4].mxu1 %v588_v61 }
  0x84   :  { %v375_v1 = vpop.permute.xlu1 %374  ;;  %v365_v2 = vpop.permute.xlu0 %364 }
  0x89   :  { %v380_v3 = vpop.permute.xlu1 %379  ;;  %v370_v4 = vpop.permute.xlu0 %369 }
  0x8d   :  { %v898_v5 = vpop.permute.xlu1 %389  ;;  %v385_v6 = vpop.permute.xlu0 %384 }
  0x91   :  { %v900_v7 = vpop.permute.xlu1 %399  ;;  %v395_v8 = vpop.permute.xlu0 %394 }
  0x95   :  { %v410_v9 = vpop.permute.xlu1 %409  ;;  %v405_v10 = vpop.permute.xlu0 %404 }
  0x99   :  { %v420_v11 = vpop.permute.xlu1 %419  ;;  %v415_v12 = vpop.permute.xlu0 %414 }
  0x9d   :  { %v902_v13 = vpop.permute.xlu1 %429  ;;  %v425_v14 = vpop.permute.xlu0 %424 }
  0xa3   :  { %v440_v40 = vpop.permute.xlu1 %439  ;;  %v435_v41 = vpop.permute.xlu0 %434 }
  0xf5   :  { %v711_v15 = vpop.f32.mrb[0].mxu0  ;;  %v719_v17 = vpop.f32.mrb[0].mxu1 }
  0xf6   :  { %v444_v18 = vmul.f32 %v711_v15, %v375_v1  ;;  %v452_v19 = vmul.f32 %v719_v17, %v415_v12  ;;  %v232_v20 = vpop.f32.mrb[1].mxu0  ;;  %v264_v21 = vpop.f32.mrb[1].mxu1 }
  0xf7   :  { %v442_v22 = vmul.f32 %v365_v2, %v232_v20  ;;  %v450_v23 = vmul.f32 %v405_v10, %v264_v21  ;;  %v712_v24 = vpop.f32.mrb[2].mxu0  ;;  %v720_v25 = vpop.f32.mrb[2].mxu1 }
  0xf8   :  { %v467_v26 = vadd.f32 %v907_v16, %v444_v18  ;;  %v475_v27 = vadd.f32 %v907_v16, %v452_v19  ;;  %v445_v28 = vmul.f32 %v712_v24, %v380_v3  ;;  %v453_v29 = vmul.f32 %v720_v25, %v420_v11  ;;  %v235_v30 = vpop.f32.mrb[3].mxu0  ;;  %v267_v31 = vpop.f32.mrb[3].mxu1 }
  0xf9   :  { %v465_v32 = vadd.f32 %v907_v16, %v442_v22  ;;  %v473_v33 = vadd.f32 %v907_v16, %v450_v23  ;;  %v443_v34 = vmul.f32 %v370_v4, %v235_v30  ;;  %v451_v35 = vmul.f32 %v410_v9, %v267_v31 }
  0xfa   :  { %v468_v36 = vadd.f32 %v907_v16, %v445_v28  ;;  %v476_v37 = vadd.f32 %v907_v16, %v453_v29  ;;  %v483_v42 = vmax.f32 %v467_v26, 0.0  ;;  %v491_v43 = vmax.f32 %v475_v27, 0.0 }
  0xfb   :  { %v466_v38 = vadd.f32 %v907_v16, %v443_v34  ;;  %v474_v39 = vadd.f32 %v907_v16, %v451_v35  ;;  %v481_v46 = vmax.f32 %v465_v32, 0.0  ;;  %v489_v47 = vmax.f32 %v473_v33, 0.0 }
  0xfc   :  { %v484_v44 = vmax.f32 %v468_v36, 0.0  ;;  %v492_v45 = vmax.f32 %v476_v37, 0.0 }
  0xfd   :  { %v482_v48 = vmax.f32 %v466_v38, 0.0  ;;  %v490_v49 = vmax.f32 %v474_v39, 0.0  ;;  %v715_v50 = vpop.f32.mrb[4].mxu0  ;;  %v723_v51 = vpop.f32.mrb[4].mxu1 }
  0xfe   :  { %v638_v52 = vpack.c.bf16 %v484_v44, %v483_v42  ;;  %v658_v53 = vpack.c.bf16 %v492_v45, %v491_v43  ;;  %v448_v54 = vmul.f32 %v715_v50, %v395_v8  ;;  %v456_v55 = vmul.f32 %v723_v51, %v435_v41  ;;  %v248_v56 = vpop.f32.mrb[5].mxu0  ;;  %v280_v57 = vpop.f32.mrb[5].mxu1 }
  0xff   :  { %v633_v58 = vpack.c.bf16 %v482_v48, %v481_v46  ;;  %v653_v59 = vpack.c.bf16 %v490_v49, %v489_v47  ;;  %v446_v60 = vmul.f32 %v385_v6, %v248_v56  ;;  %v454_v61 = vmul.f32 %v425_v14, %v280_v57  ;;  %v716_v62 = vpop.f32.mrb[6].mxu0  ;;  %v724_v63 = vpop.f32.mrb[6].mxu1 }
 0x100   :  { %670 = vst [vmem:[%s956_s4 + $0x8] sm:$0xff] %v638_v52   ;;  %674 = vst [vmem:[%s956_s4 + $0x28] sm:$0xff] %v658_v53   ;;  %v471_v0 = vadd.f32 %v907_v16, %v448_v54  ;;  %v479_v1 = vadd.f32 %v907_v16, %v456_v55  ;;  %v449_v2 = vmul.f32 %v716_v62, %v900_v7  ;;  %v251_v4 = vpop.f32.mrb[7].mxu0  ;;  %v283_v6 = vpop.f32.mrb[7].mxu1 }
 0x101   :  { %v457_v3 = vmul.f32 %v724_v63, %v440_v40  ;;  %634 = vst [vmem:[%s956_s4] sm:$0xff] %v633_v58   ;;  %673 = vst [vmem:[%s956_s4 + $0x20] sm:$0xff] %v653_v59   ;;  %v469_v8 = vadd.f32 %v907_v16, %v446_v60  ;;  %v477_v9 = vadd.f32 %v907_v16, %v454_v61 }
 0x102   :  { %v447_v10 = vmul.f32 %v898_v5, %v251_v4  ;;  %v455_v11 = vmul.f32 %v902_v13, %v283_v6  ;;  %v472_v7 = vadd.f32 %v907_v16, %v449_v2  ;;  %v487_v17 = vmax.f32 %v471_v0, 0.0 }
 0x103   :  { %v480_v12 = vadd.f32 %v907_v16, %v457_v3  ;;  %v495_v18 = vmax.f32 %v479_v1, 0.0  ;;  %v485_v21 = vmax.f32 %v469_v8, 0.0  ;;  %v493_v22 = vmax.f32 %v477_v9, 0.0 }
 0x104   :  { %v470_v14 = vadd.f32 %v907_v16, %v447_v10  ;;  %v478_v15 = vadd.f32 %v907_v16, %v455_v11  ;;  %v488_v19 = vmax.f32 %v472_v7, 0.0 }
 0x105   :  { %v496_v20 = vmax.f32 %v480_v12, 0.0 }
 0x106   :  { %v486_v23 = vmax.f32 %v470_v14, 0.0  ;;  %v494_v24 = vmax.f32 %v478_v15, 0.0  ;;  %v648_v25 = vpack.c.bf16 %v488_v19, %v487_v17 }
 0x107   :  { %v668_v5 = vpack.c.bf16 %v496_v20, %v495_v18 }
 0x108   :  { %v643_v26 = vpack.c.bf16 %v486_v23, %v485_v21  ;;  %v663_v13 = vpack.c.bf16 %v494_v24, %v493_v22  ;;  %672 = vst [vmem:[%s956_s4 + $0x18] sm:$0xff] %v648_v25  }
 0x109   :  { %676 = vst [vmem:[%s956_s4 + $0x38] sm:$0xff] %v668_v5  }
 0x10a   :  { %671 = vst [vmem:[%s956_s4 + $0x10] sm:$0xff] %v643_v26   ;;  %675 = vst [vmem:[%s956_s4 + $0x30] sm:$0xff] %v663_v13  }

// kernel: sample_conv_forward.7
= control target key start
LH: loop header
LB: loop body
LE: loop exit
PB: predicated region body
PF: predicated region fallthrough
CT: control target
= control target key end

     0   :  { %v593_v1 = vmov 0   ;;  %s793_s1 = inlined_call_operand.vmem [shape: bf16[128,128], index: 1, kind: input, shape index: {}]   ;;  %s794_s0 = inlined_call_operand.vmem [shape: s8[128,128], index: 0, kind: input, shape index: {}]   ;;  %s795_s2 = inlined_call_operand.vmem [shape: f32[128,1], index: 2, kind: input, shape index: {}]   ;;  %s796_s3 = inlined_call_operand.vmem [shape: f32[1,128], index: 3, kind: input, shape index: {}]   ;;  %s797_s4 = inlined_call_operand.vmem [shape: f32[128,128], index: 4, kind: output, shape index: {}]  }
   0x1   :  { %v585_v0 = vld [vmem:[%s793_s1] sm:$0xff]   ;;  %584 = vset.pattern.permute.xlu1 %v593_v1  ;;  %583 = vset.pattern.permute.xlu0 %v593_v1  ;;  %v586_v2 = vld [vmem:[%s793_s1 + $0x8] sm:$0xff]   ;;  %v587_v3 = vld [vmem:[%s793_s1 + $0x10] sm:$0xff]  }
   0x2   :  { %534 = vmatprep.subr.bf16.mxu0 %v585_v0  ;;  %566 = vmatprep.subr.bf16.mxu1 %v585_v0  ;;  %v588_v4 = vld [vmem:[%s793_s1 + $0x18] sm:$0xff]   ;;  %v38_v5 = vld [vmem:[%s794_s0] sm:$0x3]  ;;  %v39_v6 = vld [vmem:[%s794_s0 + $0x2] sm:$0x3] }
   0x3   :  { %535 = vmatpush3.bf16.msra.mxu0 %v585_v0  ;;  %574 = vmatpush3.bf16.msra.mxu1 %v585_v0  ;;  %v46_v7 = vld [vmem:[%s794_s0 + $0x10] sm:$0x3]  ;;  %v54_v8 = vunpack.c.l.s8.bf16 %v38_v5  ;;  %v55_v9 = vunpack.c.l.s8.bf16 %v39_v6  ;;  %v47_v10 = vld [vmem:[%s794_s0 + $0x12] sm:$0x3]  ;;  %v589_v14 = vld [vmem:[%s793_s1 + $0x20] sm:$0xff]  }
   0x4   :  { %536 = vmatprep.subr.bf16.mxu0 %v586_v2  ;;  %567 = vmatprep.subr.bf16.mxu1 %v586_v2  ;;  %v62_v11 = vunpack.c.l.s8.bf16 %v46_v7  ;;  %v63_v12 = vunpack.c.l.s8.bf16 %v47_v10  ;;  %v348_v16 = vld [vmem:[%s795_s2 + $0x10] sm:$0xff]  ;;  %v346_v17 = vld [vmem:[%s795_s2] sm:$0xff]  ;;  %v349_v18 = vld [vmem:[%s795_s2 + $0x18] sm:$0xff] }
   0x5   :  { %v501_v13 = vcombine.low %v54_v8, %v55_v9  ;;  %374 = vperm.xlu1 %584, %v348_v16   ;;  %v590_v19 = vld [vmem:[%s793_s1 + $0x28] sm:$0xff]   ;;  %364 = vperm.xlu0 %583, %v346_v17   ;;  %v591_v22 = vld [vmem:[%s793_s1 + $0x30] sm:$0xff]   ;;  %v40_v23 = vld [vmem:[%s794_s0 + $0x4] sm:$0x3] }
   0x6   :  { %v505_v15 = vcombine.low %v62_v11, %v63_v12  ;;  %v347_v20 = vld [vmem:[%s795_s2 + $0x8] sm:$0xff]  ;;  %v592_v24 = vld [vmem:[%s793_s1 + $0x38] sm:$0xff]   ;;  %v41_v25 = vld [vmem:[%s794_s0 + $0x6] sm:$0x3]  ;;  %v56_v34 = vunpack.c.l.s8.bf16 %v40_v23 }
   0x7   :  { %537 = vmatpush3.bf16.msra.mxu0 %v586_v2  ;;  %575 = vmatpush3.bf16.msra.mxu1 %v586_v2  ;;  %v351_v21 = vld [vmem:[%s795_s2 + $0x28] sm:$0xff]  ;;  %v48_v26 = vld [vmem:[%s794_s0 + $0x14] sm:$0x3]  ;;  %v350_v27 = vld [vmem:[%s795_s2 + $0x20] sm:$0xff]  ;;  %v57_v35 = vunpack.c.l.s8.bf16 %v41_v25 }
   0x8   :  { %538 = vmatprep.subr.bf16.mxu0 %v587_v3  ;;  %568 = vmatprep.subr.bf16.mxu1 %v587_v3  ;;  %v49_v28 = vld [vmem:[%s794_s0 + $0x16] sm:$0x3]  ;;  %v42_v29 = vld [vmem:[%s794_s0 + $0x8] sm:$0x3]  ;;  %v353_v30 = vld [vmem:[%s795_s2 + $0x38] sm:$0xff]  ;;  %v64_v36 = vunpack.c.l.s8.bf16 %v48_v26 }
   0x9   :  { %550 = vmatprep.mubr.bf16.mxu0 %v501_v13  ;;  %558 = vmatprep.mubr.bf16.mxu1 %v505_v15  ;;  %v43_v31 = vld [vmem:[%s794_s0 + $0xa] sm:$0x3]  ;;  %v50_v32 = vld [vmem:[%s794_s0 + $0x18] sm:$0x3]  ;;  %v51_v33 = vld [vmem:[%s794_s0 + $0x1a] sm:$0x3]  ;;  %v65_v37 = vunpack.c.l.s8.bf16 %v49_v28  ;;  %v58_v39 = vunpack.c.l.s8.bf16 %v42_v29  ;;  %v502_v44 = vcombine.low %v56_v34, %v57_v35 }
   0xa   :  { %379 = vperm.xlu1 %584, %v349_v18   ;;  %369 = vperm.xlu0 %583, %v347_v20   ;;  %v352_v38 = vld [vmem:[%s795_s2 + $0x30] sm:$0xff]  ;;  %v59_v40 = vunpack.c.l.s8.bf16 %v43_v31  ;;  %v66_v41 = vunpack.c.l.s8.bf16 %v50_v32  ;;  %v67_v42 = vunpack.c.l.s8.bf16 %v51_v33  ;;  %v355_v43 = vld [vmem:[%s795_s2 + $0x48] sm:$0xff]  ;;  %v354_v47 = vld [vmem:[%s795_s2 + $0x40] sm:$0xff] }
   0xb   :  { %539 = vmatpush3.bf16.msra.mxu0 %v587_v3  ;;  %576 = vmatpush3.bf16.msra.mxu1 %v587_v3  ;;  %v506_v45 = vcombine.low %v64_v36, %v65_v37  ;;  %v44_v46 = vld [vmem:[%s794_s0 + $0xc] sm:$0x3]  ;;  %v45_v50 = vld [vmem:[%s794_s0 + $0xe] sm:$0x3]  ;;  %v52_v51 = vld [vmem:[%s794_s0 + $0x1c] sm:$0x3] }
   0xc   :  { %540 = vmatprep.subr.bf16.mxu0 %v588_v4  ;;  %569 = vmatprep.subr.bf16.mxu1 %v588_v4  ;;  %v503_v48 = vcombine.low %v58_v39, %v59_v40  ;;  %v507_v49 = vcombine.low %v66_v41, %v67_v42  ;;  %v53_v52 = vld [vmem:[%s794_s0 + $0x1e] sm:$0x3]  ;;  %v60_v54 = vunpack.c.l.s8.bf16 %v44_v46  ;;  %v61_v55 = vunpack.c.l.s8.bf16 %v45_v50  ;;  %v356_v58 = vld [vmem:[%s795_s2 + $0x50] sm:$0xff]  ;;  %v359_v59 = vld [vmem:[%s795_s2 + $0x68] sm:$0xff] }
   0xd   :  { %v357_v53 = vld [vmem:[%s795_s2 + $0x58] sm:$0xff]  ;;  %v68_v56 = vunpack.c.l.s8.bf16 %v52_v51  ;;  %v69_v57 = vunpack.c.l.s8.bf16 %v53_v52  ;;  %v358_v62 = vld [vmem:[%s795_s2 + $0x60] sm:$0xff]  ;;  %v360_v0 = vld [vmem:[%s795_s2 + $0x70] sm:$0xff] }
   0xe   :  { %389 = vperm.xlu1 %584, %v351_v21   ;;  %384 = vperm.xlu0 %583, %v350_v27   ;;  %v504_v60 = vcombine.low %v60_v54, %v61_v55  ;;  %v361_v63 = vld [vmem:[%s795_s2 + $0x78] sm:$0xff]  ;;  %v517_v16 = vld [vmem:[%s796_s3] ss:$0 sm:$0xff] }
   0xf   :  { %541 = vmatpush3.bf16.msra.mxu0 %v588_v4  ;;  %577 = vmatpush3.bf16.msra.mxu1 %v588_v4  ;;  %v508_v61 = vcombine.low %v68_v56, %v69_v57 }
  0x10   :  { %542 = vmatprep.subr.bf16.mxu0 %v589_v14  ;;  %570 = vmatprep.subr.bf16.mxu1 %v589_v14 }
  0x12   :  { %399 = vperm.xlu1 %584, %v353_v30   ;;  %394 = vperm.xlu0 %583, %v352_v38  }
  0x13   :  { %543 = vmatpush3.bf16.msra.mxu0 %v589_v14  ;;  %578 = vmatpush3.bf16.msra.mxu1 %v589_v14 }
  0x14   :  { %544 = vmatprep.subr.bf16.mxu0 %v590_v19  ;;  %571 = vmatprep.subr.bf16.mxu1 %v590_v19 }
  0x16   :  { %409 = vperm.xlu1 %584, %v355_v43   ;;  %404 = vperm.xlu0 %583, %v354_v47  }
  0x17   :  { %545 = vmatpush3.bf16.msra.mxu0 %v590_v19  ;;  %579 = vmatpush3.bf16.msra.mxu1 %v590_v19 }
  0x18   :  { %546 = vmatprep.subr.bf16.mxu0 %v591_v22  ;;  %572 = vmatprep.subr.bf16.mxu1 %v591_v22 }
  0x1a   :  { %419 = vperm.xlu1 %584, %v357_v53   ;;  %414 = vperm.xlu0 %583, %v356_v58  }
  0x1b   :  { %547 = vmatpush3.bf16.msra.mxu0 %v591_v22  ;;  %580 = vmatpush3.bf16.msra.mxu1 %v591_v22 }
  0x1c   :  { %548 = vmatprep.subr.bf16.mxu0 %v592_v24  ;;  %573 = vmatprep.subr.bf16.mxu1 %v592_v24 }
  0x1e   :  { %429 = vperm.xlu1 %584, %v359_v59   ;;  %424 = vperm.xlu0 %583, %v358_v62  }
  0x1f   :  { %549 = vmatpush3.bf16.msra.mxu0 %v592_v24  ;;  %581 = vmatpush3.bf16.msra.mxu1 %v592_v24 }
  0x22   :  { %551 = vmatmul.mubr.bf16.vlgmr.msra.gmra.mrb[0].mxu0 %v502_v44  ;;  %559 = vmatmul.mubr.bf16.vlgmr.msra.gmra.mrb[0].mxu1 %v506_v45 }
  0x23   :  { %554 = vmatprep.mubr.bf16.mxu0 %v503_v48  ;;  %562 = vmatprep.mubr.bf16.mxu1 %v507_v49 }
  0x24   :  { %439 = vperm.xlu1 %584, %v361_v63   ;;  %434 = vperm.xlu0 %583, %v360_v0  }
  0x2a   :  { %555 = vmatmul.mubr.bf16.gmra.mrb[4].mxu0 %v504_v60  ;;  %563 = vmatmul.mubr.bf16.gmra.mrb[4].mxu1 %v508_v61 }
  0x84   :  { %v375_v1 = vpop.permute.xlu1 %374  ;;  %v365_v2 = vpop.permute.xlu0 %364 }
  0x89   :  { %v380_v3 = vpop.permute.xlu1 %379  ;;  %v370_v4 = vpop.permute.xlu0 %369 }
  0x8d   :  { %v739_v5 = vpop.permute.xlu1 %389  ;;  %v385_v6 = vpop.permute.xlu0 %384 }
  0x91   :  { %v400_v7 = vpop.permute.xlu1 %399  ;;  %v395_v8 = vpop.permute.xlu0 %394 }
  0x95   :  { %v410_v9 = vpop.permute.xlu1 %409  ;;  %v405_v10 = vpop.permute.xlu0 %404 }
  0x99   :  { %v420_v11 = vpop.permute.xlu1 %419  ;;  %v415_v12 = vpop.permute.xlu0 %414 }
  0x9d   :  { %v430_v13 = vpop.permute.xlu1 %429  ;;  %v425_v14 = vpop.permute.xlu0 %424 }
  0xa3   :  { %v440_v40 = vpop.permute.xlu1 %439  ;;  %v435_v41 = vpop.permute.xlu0 %434 }
  0xf5   :  { %v552_v15 = vpop.f32.mrb[0].mxu0  ;;  %v560_v17 = vpop.f32.mrb[0].mxu1 }
  0xf6   :  { %v444_v18 = vmul.f32 %v552_v15, %v375_v1  ;;  %v452_v19 = vmul.f32 %v560_v17, %v415_v12  ;;  %v232_v20 = vpop.f32.mrb[1].mxu0  ;;  %v264_v21 = vpop.f32.mrb[1].mxu1 }
  0xf7   :  { %v442_v22 = vmul.f32 %v365_v2, %v232_v20  ;;  %v450_v23 = vmul.f32 %v405_v10, %v264_v21  ;;  %v553_v24 = vpop.f32.mrb[2].mxu0  ;;  %v561_v25 = vpop.f32.mrb[2].mxu1 }
  0xf8   :  { %v467_v26 = vadd.f32 %v517_v16, %v444_v18  ;;  %v475_v27 = vadd.f32 %v517_v16, %v452_v19  ;;  %v445_v28 = vmul.f32 %v553_v24, %v380_v3  ;;  %v453_v29 = vmul.f32 %v561_v25, %v420_v11  ;;  %v235_v30 = vpop.f32.mrb[3].mxu0  ;;  %v267_v31 = vpop.f32.mrb[3].mxu1 }
  0xf9   :  { %v465_v32 = vadd.f32 %v517_v16, %v442_v22  ;;  %v473_v33 = vadd.f32 %v517_v16, %v450_v23  ;;  %v443_v34 = vmul.f32 %v370_v4, %v235_v30  ;;  %v451_v35 = vmul.f32 %v410_v9, %v267_v31 }
  0xfa   :  { %483 = vst [vmem:[%s797_s4 + $0x10] sm:$0xff] %v467_v26  ;;  %491 = vst [vmem:[%s797_s4 + $0x50] sm:$0xff] %v475_v27  ;;  %v468_v36 = vadd.f32 %v517_v16, %v445_v28  ;;  %v476_v37 = vadd.f32 %v517_v16, %v453_v29 }
  0xfb   :  { %481 = vst [vmem:[%s797_s4] sm:$0xff] %v465_v32  ;;  %489 = vst [vmem:[%s797_s4 + $0x40] sm:$0xff] %v473_v33  ;;  %v466_v38 = vadd.f32 %v517_v16, %v443_v34  ;;  %v474_v39 = vadd.f32 %v517_v16, %v451_v35 }
  0xfc   :  { %484 = vst [vmem:[%s797_s4 + $0x18] sm:$0xff] %v468_v36  ;;  %492 = vst [vmem:[%s797_s4 + $0x58] sm:$0xff] %v476_v37 }
  0xfd   :  { %482 = vst [vmem:[%s797_s4 + $0x8] sm:$0xff] %v466_v38  ;;  %490 = vst [vmem:[%s797_s4 + $0x48] sm:$0xff] %v474_v39  ;;  %v556_v42 = vpop.f32.mrb[4].mxu0  ;;  %v564_v43 = vpop.f32.mrb[4].mxu1 }
  0xfe   :  { %v448_v44 = vmul.f32 %v556_v42, %v395_v8  ;;  %v456_v45 = vmul.f32 %v564_v43, %v435_v41  ;;  %v248_v46 = vpop.f32.mrb[5].mxu0  ;;  %v280_v47 = vpop.f32.mrb[5].mxu1 }
  0xff   :  { %v446_v48 = vmul.f32 %v385_v6, %v248_v46  ;;  %v454_v49 = vmul.f32 %v425_v14, %v280_v47  ;;  %v557_v50 = vpop.f32.mrb[6].mxu0  ;;  %v565_v51 = vpop.f32.mrb[6].mxu1 }
 0x100   :  { %v471_v52 = vadd.f32 %v517_v16, %v448_v44  ;;  %v479_v53 = vadd.f32 %v517_v16, %v456_v45  ;;  %v449_v54 = vmul.f32 %v557_v50, %v400_v7  ;;  %v457_v55 = vmul.f32 %v565_v51, %v440_v40  ;;  %v251_v56 = vpop.f32.mrb[7].mxu0  ;;  %v283_v57 = vpop.f32.mrb[7].mxu1 }
 0x101   :  { %v469_v58 = vadd.f32 %v517_v16, %v446_v48  ;;  %v477_v59 = vadd.f32 %v517_v16, %v454_v49  ;;  %v447_v60 = vmul.f32 %v739_v5, %v251_v56  ;;  %v455_v61 = vmul.f32 %v430_v13, %v283_v57 }
 0x102   :  { %487 = vst [vmem:[%s797_s4 + $0x30] sm:$0xff] %v471_v52  ;;  %495 = vst [vmem:[%s797_s4 + $0x70] sm:$0xff] %v479_v53  ;;  %v472_v62 = vadd.f32 %v517_v16, %v449_v54  ;;  %v480_v63 = vadd.f32 %v517_v16, %v457_v55 }
 0x103   :  { %485 = vst [vmem:[%s797_s4 + $0x20] sm:$0xff] %v469_v58  ;;  %493 = vst [vmem:[%s797_s4 + $0x60] sm:$0xff] %v477_v59  ;;  %v470_v0 = vadd.f32 %v517_v16, %v447_v60  ;;  %v478_v1 = vadd.f32 %v517_v16, %v455_v61 }
 0x104   :  { %488 = vst [vmem:[%s797_s4 + $0x38] sm:$0xff] %v472_v62  ;;  %496 = vst [vmem:[%s797_s4 + $0x78] sm:$0xff] %v480_v63 }
 0x105   :  { %486 = vst [vmem:[%s797_s4 + $0x28] sm:$0xff] %v470_v0  ;;  %494 = vst [vmem:[%s797_s4 + $0x68] sm:$0xff] %v478_v1 }

</bundles_post_ra>
